<compile_context>
chip_gen: v7x
topology: tpu7x:2x2x1
jax: 0.10.0
libtpu: 0.0.40
codegen_flags: <defaults>
</compile_context>

<pallas_src>
import functools

import jax
import jax.numpy as jnp
from jax.experimental import pallas as pl
from jax.experimental.pallas import tpu as pltpu

LANE = 128


def _round_up(a, m):
    return ((a + m - 1) // m) * m


def _pick_act_dtype():
    """bf16 inter-layer activations on bf16-VPU chips (v6e/v7x), f32 elsewhere."""
    try:
        kind = jax.devices()[0].device_kind.lower()
    except Exception:
        return jnp.float32
    if "v6" in kind or "v7" in kind:
        return jnp.bfloat16
    return jnp.float32


def _fused_mlp_kernel(x_ref, w1_ref, wr_ref, s_ref, o_ref, *, num_hidden, act_dtype):
    """One batch tile through the whole MLP.

    x_ref : [TILE_B, K]                (f32 or bf16)
    w1_ref: [K, H]        bf16         (BN scale folded in)
    wr_ref: [num_hidden, H, H] bf16    (hidden layers 2..num_hidden, then padded W_out)
    s_ref : [num_hidden+1, H]  f32     (per-layer shifts, then padded output bias)
    o_ref : [TILE_B, H]   f32          (lane-dense padded output slab)
    """
    h = x_ref[...].astype(jnp.bfloat16)

    # Layer 1 (K -> H)
    acc = jnp.dot(h, w1_ref[...], preferred_element_type=jnp.float32)
    h = jnp.maximum(acc + s_ref[pl.ds(0, 1), :], 0.0).astype(act_dtype)
    # dropout(p=0.3, training=False) -> identity (eval mode)

    # Hidden layers 2..num_hidden (H -> H)
    for li in range(1, num_hidden):
        acc = jnp.dot(h.astype(jnp.bfloat16), wr_ref[li - 1],
                      preferred_element_type=jnp.float32)
        h = jnp.maximum(acc + s_ref[pl.ds(li, 1), :], 0.0).astype(act_dtype)

    # Output layer (H -> H_pad, zero columns beyond output_size)
    acc = jnp.dot(h.astype(jnp.bfloat16), wr_ref[num_hidden - 1],
                  preferred_element_type=jnp.float32)
    o_ref[...] = (acc + s_ref[pl.ds(num_hidden, 1), :]).astype(o_ref.dtype)


def fused_mlp(x, w1, w_rest, shifts, *, output_size, act_dtype=jnp.float32):
    """x: [B, K] f32.  Returns [B, output_size] f32."""
    B, K = x.shape
    num_hidden = shifts.shape[0] - 1
    H = w_rest.shape[1]
    n_pad = w_rest.shape[2]

    # Batch tile: sublane/bf16-pack aligned (>=16 rows), up to 128 rows per step.
    tile_b = 128 if B >= 128 else _round_up(max(B, 8), 16)
    b_pad = _round_up(B, tile_b)

    xp = x.astype(act_dtype)
    if b_pad != B:
        xp = jnp.pad(xp, ((0, b_pad - B), (0, 0)))
    grid = (b_pad // tile_b,)

    flops = 2 * b_pad * (K * H + (num_hidden - 1) * H * H + H * n_pad)
    bytes_accessed = (
        xp.size * xp.dtype.itemsize
        + w1.size * w1.dtype.itemsize
        + w_rest.size * w_rest.dtype.itemsize
        + shifts.size * shifts.dtype.itemsize
        + b_pad * n_pad * 4)

    kernel = functools.partial(_fused_mlp_kernel,
                               num_hidden=num_hidden, act_dtype=act_dtype)

    out_padded = pl.pallas_call(
        kernel,
        out_shape=jax.ShapeDtypeStruct((b_pad, n_pad), jnp.float32),
        grid=grid,
        in_specs=[
            pl.BlockSpec((tile_b, K), lambda i: (i, 0)),        # x: tiled over batch
            pl.BlockSpec(w1.shape, lambda i: (0, 0)),           # resident weights
            pl.BlockSpec(w_rest.shape, lambda i: (0, 0, 0)),
            pl.BlockSpec(shifts.shape, lambda i: (0, 0)),
        ],
        out_specs=pl.BlockSpec((tile_b, n_pad), lambda i: (i, 0)),
        compiler_params=pltpu.CompilerParams(
            dimension_semantics=("parallel",)),
        cost_estimate=pl.CostEstimate(flops=flops, transcendentals=0,
                                      bytes_accessed=bytes_accessed),
    )(xp, w1, w_rest, shifts)
    return out_padded[:B, :output_size]


class ComplexModelPallas:
    """JAX/Pallas port of the PyTorch ComplexModel, inference mode."""

    def __init__(self, key, input_size=256, hidden_size=128, num_layers=3,
                 output_size=16, eps=1e-5):
        assert hidden_size % LANE == 0, "stacked-weight path needs lane-aligned hidden"
        assert output_size <= hidden_size, "output padded into hidden-sized slab"
        self.input_size = input_size
        self.hidden_size = hidden_size
        self.num_layers = num_layers
        self.output_size = output_size
        self.act_dtype = _pick_act_dtype()

        dims = [input_size] + [hidden_size] * num_layers
        keys = jax.random.split(key, 4 * num_layers + 2)
        ki = iter(range(len(keys)))

        self._f32_hidden = []          # unfolded params for the f32 sanity ref
        rest_w, shift_rows = [], []
        w1 = None
        for li in range(num_layers):
            fan_in, fan_out = dims[li], dims[li + 1]
            bound = 1.0 / jnp.sqrt(fan_in)
            # Linear (PyTorch init: U(-1/sqrt(fan_in), 1/sqrt(fan_in)))
            w = jax.random.uniform(keys[next(ki)], (fan_in, fan_out),
                                   jnp.float32, -bound, bound)
            b = jax.random.uniform(keys[next(ki)], (fan_out,),
                                   jnp.float32, -bound, bound)
            # BatchNorm1d running stats + affine (deterministic, non-trivial gamma/beta)
            gamma = 1.0 + 0.1 * jax.random.normal(keys[next(ki)], (fan_out,), jnp.float32)
            beta = 0.1 * jax.random.normal(keys[next(ki)], (fan_out,), jnp.float32)
            running_mean = jnp.zeros((fan_out,), jnp.float32)
            running_var = jnp.ones((fan_out,), jnp.float32)
            # bn(xW + b) = (xW)*scale + shift
            scale = gamma / jnp.sqrt(running_var + eps)
            shift = (b - running_mean) * scale + beta
            w_folded = (w * scale[None, :]).astype(jnp.bfloat16)
            if li == 0:
                w1 = w_folded
            else:
                rest_w.append(w_folded)
            shift_rows.append(shift)
            self._f32_hidden.append((w, scale[None, :], shift[None, :]))

        # Output Linear (no BN / relu) — zero-pad columns to hidden_size (lane-dense).
        bound = 1.0 / jnp.sqrt(hidden_size)
        w_out = jax.random.uniform(keys[next(ki)], (hidden_size, output_size),
                                   jnp.float32, -bound, bound)
        b_out = jax.random.uniform(keys[next(ki)], (output_size,),
                                   jnp.float32, -bound, bound)
        w_out_pad = jnp.zeros((hidden_size, hidden_size), jnp.float32)
        w_out_pad = w_out_pad.at[:, :output_size].set(w_out)
        b_out_pad = jnp.zeros((hidden_size,), jnp.float32)
        b_out_pad = b_out_pad.at[:output_size].set(b_out)

        # Stacked kernel inputs: 3 DMAs total instead of 8.
        self.w1 = w1                                                   # [K, H]    bf16
        self.w_rest = jnp.stack(rest_w + [w_out_pad.astype(jnp.bfloat16)])  # [L, H, H] bf16
        self.shifts = jnp.stack(shift_rows + [b_out_pad])              # [L+1, H]  f32
        self._f32_out = (w_out, b_out[None, :])

    def __call__(self, x):
        batch_size = x.shape[0]
        x = x.reshape(batch_size, -1).astype(jnp.float32)
        if x.shape[1] != self.input_size:
            raise ValueError(
                f"input feature count {x.shape[1]} != expected {self.input_size}")
        return fused_mlp(x, self.w1, self.w_rest, self.shifts,
                         output_size=self.output_size, act_dtype=self.act_dtype)

    def reference_bf16(self, x):
        """Pure-JAX reference matching the kernel's bf16-matmul/f32-acc math."""
        h = x.reshape(x.shape[0], -1).astype(jnp.float32)
        for li in range(self.num_layers):
            w = self.w1 if li == 0 else self.w_rest[li - 1]
            acc = jnp.dot(h.astype(jnp.bfloat16), w, preferred_element_type=jnp.float32)
            h = jnp.maximum(acc + self.shifts[li], 0.0)
        acc = jnp.dot(h.astype(jnp.bfloat16), self.w_rest[self.num_layers - 1],
                      preferred_element_type=jnp.float32)
        y = acc + self.shifts[self.num_layers]
        return y[:, :self.output_size]

    def reference_f32(self, x):
        """Full-precision reference of the original (unfolded) module math."""
        h = x.reshape(x.shape[0], -1).astype(jnp.float32)
        for (w, scale, shift) in self._f32_hidden:
            h = jnp.maximum(h @ w * scale + shift, 0.0)
        w, b = self._f32_out
        return h @ w + b


if __name__ == "__main__":
    key = jax.random.PRNGKey(0)
    k_model, k_x = jax.random.split(key)

    # Small shapes consistent with forward: x is flattened to [B, input_size].
    B, C, H, W = 8, 1, 16, 16               # 1*16*16 = 256 = input_size
    model = ComplexModelPallas(k_model, input_size=C * H * W,
                               hidden_size=128, num_layers=3, output_size=16)

    x = jax.random.normal(k_x, (B, C, H, W), jnp.float32)

    out = jax.block_until_ready(model(x))
    assert out.shape == (B, 16), out.shape

    # Tight check vs. the matching bf16-matmul reference.
    ref_bf16 = model.reference_bf16(x)
    assert jnp.allclose(out, ref_bf16, atol=5e-4, rtol=5e-4), \
        f"max abs err vs bf16 ref: {jnp.max(jnp.abs(out - ref_bf16))}"

    # Loose sanity check vs. the full-f32 original-module math.
    ref_f32 = model.reference_f32(x)
    assert jnp.allclose(out, ref_f32, atol=5e-2, rtol=5e-2), \
        f"max abs err vs f32 ref: {jnp.max(jnp.abs(out - ref_f32))}"

    print("KERNEL_OK")
</pallas_src>

<mosaic_0001>
module attributes {stable_mosaic.version = 11 : i64} {
  func.func @_fused_mlp_kernel(%arg0: i32, %arg1: memref<16x256xf32, #tpu.memory_space<vmem>>, %arg2: memref<256x128xbf16, #tpu.memory_space<vmem>>, %arg3: memref<3x128x128xbf16, #tpu.memory_space<vmem>>, %arg4: memref<4x128xf32, #tpu.memory_space<vmem>>, %arg5: memref<16x128xf32, #tpu.memory_space<vmem>>) attributes {dimension_semantics = [#tpu.dimension_semantics<parallel>], iteration_bounds = array<i64: 1>, scalar_prefetch = 0 : i64, scratch_operands = 0 : i64, tpu.core_type = #tpu.core_type<tc>, window_params = [{transform_indices = @transform_0, window_bounds = array<i64: 16, 256>}, {pipeline_mode = #tpu.pipeline_mode<synchronous>, transform_indices = @transform_1, window_bounds = array<i64: 256, 128>}, {pipeline_mode = #tpu.pipeline_mode<synchronous>, transform_indices = @transform_2, window_bounds = array<i64: 3, 128, 128>}, {pipeline_mode = #tpu.pipeline_mode<synchronous>, transform_indices = @transform_3, window_bounds = array<i64: 4, 128>}, {transform_indices = @transform_4, window_bounds = array<i64: 16, 128>}]} {
    %c0 = arith.constant 0 : index
    %c0_0 = arith.constant 0 : index
    %0 = vector.load %arg1[%c0, %c0_0] : memref<16x256xf32, #tpu.memory_space<vmem>>, vector<16x256xf32>
    %1 = arith.truncf %0 : vector<16x256xf32> to vector<16x256xbf16>
    %c0_1 = arith.constant 0 : index
    %c0_2 = arith.constant 0 : index
    %2 = vector.load %arg2[%c0_1, %c0_2] : memref<256x128xbf16, #tpu.memory_space<vmem>>, vector<256x128xbf16>
    %cst = arith.constant dense<0.000000e+00> : vector<16x128xf32>
    %3 = tpu.matmul %1, %2, %cst {dimension_numbers = #tpu.dot_dimension_numbers<[1], [0], [0], [1], [0, 0, 1, 1], [], []>} : vector<16x256xbf16>, vector<256x128xbf16>, vector<16x128xf32> -> vector<16x128xf32>
    %c0_3 = arith.constant 0 : index
    %c0_4 = arith.constant 0 : index
    %4 = vector.load %arg4[%c0_3, %c0_4] : memref<4x128xf32, #tpu.memory_space<vmem>>, vector<1x128xf32>
    %5 = vector.broadcast %4 : vector<1x128xf32> to vector<16x128xf32>
    %6 = arith.addf %3, %5 : vector<16x128xf32>
    %cst_5 = arith.constant 0.000000e+00 : f32
    %7 = vector.broadcast %cst_5 : f32 to vector<16x128xf32>
    %8 = arith.maximumf %6, %7 : vector<16x128xf32>
    %9 = arith.truncf %8 : vector<16x128xf32> to vector<16x128xbf16>
    %c0_6 = arith.constant 0 : index
    %c0_7 = arith.constant 0 : index
    %c0_8 = arith.constant 0 : index
    %10 = vector.load %arg3[%c0_6, %c0_7, %c0_8] : memref<3x128x128xbf16, #tpu.memory_space<vmem>>, vector<1x128x128xbf16>
    %11 = vector.shape_cast %10 : vector<1x128x128xbf16> to vector<128x128xbf16>
    %cst_9 = arith.constant dense<0.000000e+00> : vector<16x128xf32>
    %12 = tpu.matmul %9, %11, %cst_9 {dimension_numbers = #tpu.dot_dimension_numbers<[1], [0], [0], [1], [0, 0, 1, 1], [], []>} : vector<16x128xbf16>, vector<128x128xbf16>, vector<16x128xf32> -> vector<16x128xf32>
    %c1 = arith.constant 1 : index
    %c0_10 = arith.constant 0 : index
    %13 = vector.load %arg4[%c1, %c0_10] : memref<4x128xf32, #tpu.memory_space<vmem>>, vector<1x128xf32>
    %14 = vector.broadcast %13 : vector<1x128xf32> to vector<16x128xf32>
    %15 = arith.addf %12, %14 : vector<16x128xf32>
    %cst_11 = arith.constant 0.000000e+00 : f32
    %16 = vector.broadcast %cst_11 : f32 to vector<16x128xf32>
    %17 = arith.maximumf %15, %16 : vector<16x128xf32>
    %18 = arith.truncf %17 : vector<16x128xf32> to vector<16x128xbf16>
    %c1_12 = arith.constant 1 : index
    %c0_13 = arith.constant 0 : index
    %c0_14 = arith.constant 0 : index
    %19 = vector.load %arg3[%c1_12, %c0_13, %c0_14] : memref<3x128x128xbf16, #tpu.memory_space<vmem>>, vector<1x128x128xbf16>
    %20 = vector.shape_cast %19 : vector<1x128x128xbf16> to vector<128x128xbf16>
    %cst_15 = arith.constant dense<0.000000e+00> : vector<16x128xf32>
    %21 = tpu.matmul %18, %20, %cst_15 {dimension_numbers = #tpu.dot_dimension_numbers<[1], [0], [0], [1], [0, 0, 1, 1], [], []>} : vector<16x128xbf16>, vector<128x128xbf16>, vector<16x128xf32> -> vector<16x128xf32>
    %c2 = arith.constant 2 : index
    %c0_16 = arith.constant 0 : index
    %22 = vector.load %arg4[%c2, %c0_16] : memref<4x128xf32, #tpu.memory_space<vmem>>, vector<1x128xf32>
    %23 = vector.broadcast %22 : vector<1x128xf32> to vector<16x128xf32>
    %24 = arith.addf %21, %23 : vector<16x128xf32>
    %cst_17 = arith.constant 0.000000e+00 : f32
    %25 = vector.broadcast %cst_17 : f32 to vector<16x128xf32>
    %26 = arith.maximumf %24, %25 : vector<16x128xf32>
    %27 = arith.truncf %26 : vector<16x128xf32> to vector<16x128xbf16>
    %c2_18 = arith.constant 2 : index
    %c0_19 = arith.constant 0 : index
    %c0_20 = arith.constant 0 : index
    %28 = vector.load %arg3[%c2_18, %c0_19, %c0_20] : memref<3x128x128xbf16, #tpu.memory_space<vmem>>, vector<1x128x128xbf16>
    %29 = vector.shape_cast %28 : vector<1x128x128xbf16> to vector<128x128xbf16>
    %cst_21 = arith.constant dense<0.000000e+00> : vector<16x128xf32>
    %30 = tpu.matmul %27, %29, %cst_21 {dimension_numbers = #tpu.dot_dimension_numbers<[1], [0], [0], [1], [0, 0, 1, 1], [], []>} : vector<16x128xbf16>, vector<128x128xbf16>, vector<16x128xf32> -> vector<16x128xf32>
    %c3 = arith.constant 3 : index
    %c0_22 = arith.constant 0 : index
    %31 = vector.load %arg4[%c3, %c0_22] : memref<4x128xf32, #tpu.memory_space<vmem>>, vector<1x128xf32>
    %32 = vector.broadcast %31 : vector<1x128xf32> to vector<16x128xf32>
    %33 = arith.addf %30, %32 : vector<16x128xf32>
    %c0_23 = arith.constant 0 : index
    %c0_24 = arith.constant 0 : index
    %34 = vector.load %arg5[%c0_23, %c0_24] : memref<16x128xf32, #tpu.memory_space<vmem>>, vector<16x128xf32>
    tpu.vector_store %arg5[%c0_23, %c0_24], %33 {strides = array<i32>} : memref<16x128xf32, #tpu.memory_space<vmem>>, vector<16x128xf32>,
    return
  }
  func.func @transform_0(%arg0: i32) -> (i32, i32) {
    %c0_i32 = arith.constant 0 : i32
    %c0_i32_0 = arith.constant 0 : i32
    return %arg0, %c0_i32 : i32, i32
  }
  func.func @transform_1(%arg0: i32) -> (i32, i32) {
    %c0_i32 = arith.constant 0 : i32
    %c0_i32_0 = arith.constant 0 : i32
    %c0_i32_1 = arith.constant 0 : i32
    return %c0_i32, %c0_i32_0 : i32, i32
  }
  func.func @transform_2(%arg0: i32) -> (i32, i32, i32) {
    %c0_i32 = arith.constant 0 : i32
    %c0_i32_0 = arith.constant 0 : i32
    %c0_i32_1 = arith.constant 0 : i32
    %c0_i32_2 = arith.constant 0 : i32
    return %c0_i32, %c0_i32_0, %c0_i32_1 : i32, i32, i32
  }
  func.func @transform_3(%arg0: i32) -> (i32, i32) {
    %c0_i32 = arith.constant 0 : i32
    %c0_i32_0 = arith.constant 0 : i32
    %c0_i32_1 = arith.constant 0 : i32
    return %c0_i32, %c0_i32_0 : i32, i32
  }
  func.func @transform_4(%arg0: i32) -> (i32, i32) {
    %c0_i32 = arith.constant 0 : i32
    %c0_i32_0 = arith.constant 0 : i32
    return %arg0, %c0_i32 : i32, i32
  }
}

</mosaic_0001>

<bundles_post_ra>
// kernel: tpu_custom_call.1
= control target key start
LH: loop header
LB: loop body
LE: loop exit
PB: predicated region body
PF: predicated region fallthrough
CT: control target
= control target key end

     0   :  { %9 = vsyncpa [#allocation3], 0  ;;  %s1033_s0 = inlined_call_operand.hbm [shape: f32[16,256], index: 0, kind: input, shape index: {}]   ;;  %s1034_s1 = inlined_call_operand.hbm [shape: bf16[256,128], index: 1, kind: input, shape index: {}]   ;;  %s1035_s2 = inlined_call_operand.hbm [shape: bf16[3,128,128], index: 2, kind: input, shape index: {}]   ;;  %s1036_s3 = inlined_call_operand.vmem [shape: f32[4,128], index: 3, kind: input, shape index: {}]   ;;  %s1037_s4 = inlined_call_operand.hbm [shape: f32[16,128], index: 4, kind: output, shape index: {}]  }
   0x1   :  { %10 = vsyncpa [#allocation6], 0 }
   0x2   :  { %11 = vsyncpa [#allocation4], 0  ;;  %s900_s15 = smov [#allocation5]   ;;  %s806_s19 = scalar_lea.hbm %s1034_s1, 2048 }
   0x3   :  { %s29_s16 = sshll.u32 %s900_s15, 4  ;;  %p807_p0 = scmp.ne.s32.totalorder %s1034_s1, %s806_s19  ;;  %s30_s16 = int_to_ptr.vmem [resolvable:$true] %s29_s16 }
   0x4   :  { %p810_p1 = scmp.lt.u32.totalorder %s806_s19, %s1034_s1 }
   0x6   :  { %p812_p2 = pnand %p810_p1, %p807_p0 }
   0x8   :  { %815 = shalt.err (!%p812_p2)
}
   0x9   :  { %s816_s24 = scalar_lea.vmem %s30_s16, 2048  ;;  %p821_p4 = scmp.lt.s32.totalorder %s30_s16, %s30_s16 }
   0xa   :  { %p817_p3 = scmp.ne.s32.totalorder %s30_s16, %s816_s24  ;;  %p822_p5 = scmp.lt.s32.totalorder %s816_s24, %s816_s24 }
   0xc   :  { %p823_p6 = por %p822_p5, %p821_p4 }
   0xe   :  { %p824_p7 = pnand %p823_p6, %p817_p3 }
  0x10   :  { %827 = shalt.err (!%p824_p7)
}
  0x11   :  { %s901_s25 = smov 64   ;;  %s902_s26 = smov 4  }
  0x12   :  { %35 = dma.hbm_to_vmem [thread:$0]  %s1034_s1, 2048, %s30_s16, [#allocation6], %s901_s25, %s901_s25, %s902_s26  }
  0x13   :  { %s903_s29 = smov [#allocation2]   ;;  %s828_s7 = scalar_lea.hbm %s1033_s0, 512 }
  0x14   :  { %s17_s30 = sshll.u32 %s903_s29, 4  ;;  %p829_p8 = scmp.ne.s32.totalorder %s1033_s0, %s828_s7  ;;  %s18_s30 = int_to_ptr.vmem [resolvable:$true] %s17_s30 }
  0x15   :  { %p832_p9 = scmp.lt.u32.totalorder %s828_s7, %s1033_s0 }
  0x17   :  { %p834_p10 = pnand %p832_p9, %p829_p8 }
  0x19   :  { %837 = shalt.err (!%p834_p10)
}
  0x1a   :  { %s838_s12 = scalar_lea.vmem %s18_s30, 512  ;;  %p843_p12 = scmp.lt.s32.totalorder %s18_s30, %s18_s30 }
  0x1b   :  { %p839_p11 = scmp.ne.s32.totalorder %s18_s30, %s838_s12  ;;  %p844_p13 = scmp.lt.s32.totalorder %s838_s12, %s838_s12 }
  0x1d   :  { %p845_p0 = por %p844_p13, %p843_p12 }
  0x1f   :  { %p846_p1 = pnand %p845_p0, %p839_p11 }
  0x21   :  { %849 = shalt.err (!%p846_p1)
}
  0x22   :  { %s904_s1 = smov 256   ;;  %s905_s13 = smov 16  }
  0x23   :  { %23 = dma.hbm_to_vmem [thread:$0]  %s1033_s0, 512, %s18_s30, [#allocation3], %s904_s1, %s904_s1, %s905_s13  }
  0x24   :  { %s906_s16 = smov [#allocation7]   ;;  %s850_s20 = scalar_lea.hbm %s1035_s2, 3072 }
  0x25   :  { %s41_s17 = sshll.u32 %s906_s16, 4  ;;  %p851_p2 = scmp.ne.s32.totalorder %s1035_s2, %s850_s20  ;;  %s42_s17 = int_to_ptr.vmem [resolvable:$true] %s41_s17 }
  0x26   :  { %p854_p3 = scmp.lt.u32.totalorder %s850_s20, %s1035_s2 }
  0x28   :  { %p856_p4 = pnand %p854_p3, %p851_p2 }
  0x2a   :  { %859 = shalt.err (!%p856_p4)
}
  0x2b   :  { %s860_s27 = scalar_lea.vmem %s42_s17, 3072  ;;  %p865_p6 = scmp.lt.s32.totalorder %s42_s17, %s42_s17 }
  0x2c   :  { %p861_p5 = scmp.ne.s32.totalorder %s42_s17, %s860_s27  ;;  %p866_p7 = scmp.lt.s32.totalorder %s860_s27, %s860_s27 }
  0x2e   :  { %p867_p8 = por %p866_p7, %p865_p6 }
  0x30   :  { %p868_p9 = pnand %p867_p8, %p861_p5 }
  0x32   :  { %871 = shalt.err (!%p868_p9)
}
  0x33   :  { %47 = dma.hbm_to_vmem [thread:$0]  %s1035_s2, 3072, %s42_s17, [#allocation6], %s901_s25, %s901_s25, %s902_s26  }
  0x34   :  { %894 = dma.done.wait [#allocation3], 512  }
  0x35   :  { %895 = vsyncadd [#allocation3], 4294966784 }
  0x36   :  { %896 = dma.done.wait [#allocation6], 5120  }
  0x37   :  { %897 = vsyncadd [#allocation6], 4294962176  ;;  %v907_v0 = vmov 0.0   ;;  %v766_v1 = vld [vmem:[#allocation5 + $0x40] sm:$0xff]   ;;  %v768_v3 = vld [vmem:[#allocation5 + $0x48] sm:$0xff]   ;;  %vm908_vm0 = vmmov 0  }
  0x38   :  { %694 = vmatprep.subr.bf16.mxu1 %v907_v0  ;;  %v767_v2 = vld [vmem:[#allocation5] sm:$0xff]   ;;  %645 = vmatprep.subr.bf16.mxu0 %v766_v1  ;;  %v769_v4 = vld [vmem:[#allocation5 + $0x8] sm:$0xff]   ;;  %v770_v5 = vld [vmem:[#allocation5 + $0x50] sm:$0xff]   ;;  %s909_s8 = smov [#allocation8]  }
  0x39   :  { %646 = vmatpush3.bf16.msra.mxu0 %v767_v2  ;;  %v771_v6 = vld [vmem:[#allocation5 + $0x10] sm:$0xff]   ;;  %v772_v7 = vld [vmem:[#allocation5 + $0x58] sm:$0xff]   ;;  %v774_v9 = vld [vmem:[#allocation5 + $0x60] sm:$0xff]   ;;  %710 = vmatprep.mubr.msk.bf16.mxu1 %vm908_vm0, %v907_v0  ;;  %s588_s9 = sshll.u32 %s909_s8, 4  ;;  %s589_s9 = int_to_ptr.vmem [resolvable:$true] %s588_s9 }
  0x3a   :  { %647 = vmatprep.subr.bf16.mxu0 %v768_v3  ;;  %v773_v8 = vld [vmem:[#allocation5 + $0x18] sm:$0xff]   ;;  %v775_v10 = vld [vmem:[#allocation5 + $0x20] sm:$0xff]   ;;  %v776_v11 = vld [vmem:[#allocation5 + $0x68] sm:$0xff]   ;;  %s872_s10 = scalar_lea.vmem %s589_s9, 256  ;;  %p877_p11 = scmp.lt.s32.totalorder %s589_s9, %s589_s9 }
  0x3b   :  { %v61_v12 = vld [vmem:[#allocation2 + $0x8] sm:$0xff]  ;;  %v63_v13 = vld [vmem:[#allocation2 + $0x18] sm:$0xff]  ;;  %v782_v16 = vld [vmem:[#allocation7] sm:$0xff]   ;;  %p873_p10 = scmp.ne.s32.totalorder %s589_s9, %s872_s10  ;;  %p878_p12 = scmp.lt.s32.totalorder %s872_s10, %s872_s10 }
  0x3c   :  { %v777_v14 = vld [vmem:[#allocation5 + $0x28] sm:$0xff]   ;;  %v65_v15 = vpack.c.bf16 %v63_v13, %v61_v12  ;;  %v778_v17 = vld [vmem:[#allocation5 + $0x70] sm:$0xff]   ;;  %695 = vmatpush3.bf16.msra.mxu1 %v782_v16  ;;  %v780_v20 = vld [vmem:[#allocation5 + $0x78] sm:$0xff]  }
  0x3d   :  { %648 = vmatpush3.bf16.msra.mxu0 %v769_v4  ;;  %v783_v18 = vld [vmem:[#allocation7 + $0x8] sm:$0xff]   ;;  %v779_v19 = vld [vmem:[#allocation5 + $0x30] sm:$0xff]   ;;  %696 = vmatprep.subr.bf16.mxu1 %v907_v0  ;;  %v781_v22 = vld [vmem:[#allocation5 + $0x38] sm:$0xff]   ;;  %p879_p13 = por %p878_p12, %p877_p11 }
  0x3e   :  { %649 = vmatprep.subr.bf16.mxu0 %v770_v5  ;;  %231 = vmatprep.mubr.bf16.mxu0 %v65_v15  ;;  %v784_v21 = vld [vmem:[#allocation7 + $0x10] sm:$0xff]   ;;  %v60_v23 = vld [vmem:[#allocation2] sm:$0xff]  ;;  %v785_v25 = vld [vmem:[#allocation7 + $0x18] sm:$0xff]  }
  0x3f   :  { %v62_v24 = vld [vmem:[#allocation2 + $0x10] sm:$0xff]  ;;  %v786_v27 = vld [vmem:[#allocation7 + $0x20] sm:$0xff]   ;;  %v787_v28 = vld [vmem:[#allocation7 + $0x28] sm:$0xff]   ;;  %p880_p0 = pnand %p879_p13, %p873_p10 }
  0x40   :  { %697 = vmatpush3.bf16.msra.mxu1 %v783_v18  ;;  %v64_v26 = vpack.c.bf16 %v62_v24, %v60_v23  ;;  %v788_v29 = vld [vmem:[#allocation7 + $0x30] sm:$0xff]   ;;  %v789_v30 = vld [vmem:[#allocation7 + $0x38] sm:$0xff]   ;;  %v790_v31 = vld [vmem:[#allocation7 + $0x40] sm:$0xff]  }
  0x41   :  { %650 = vmatpush3.bf16.msra.mxu0 %v771_v6  ;;  %698 = vmatprep.subr.bf16.mxu1 %v907_v0  ;;  %v791_v32 = vld [vmem:[#allocation7 + $0x48] sm:$0xff]   ;;  %v792_v33 = vld [vmem:[#allocation7 + $0x50] sm:$0xff]   ;;  %v793_v34 = vld [vmem:[#allocation7 + $0x58] sm:$0xff]  }
  0x42   :  { %651 = vmatprep.subr.bf16.mxu0 %v772_v7  ;;  %v794_v35 = vld [vmem:[#allocation7 + $0x60] sm:$0xff]   ;;  %v795_v36 = vld [vmem:[#allocation7 + $0x68] sm:$0xff]   ;;  %v796_v49 = vld [vmem:[#allocation7 + $0x70] sm:$0xff]  }
  0x43   :  { %v601_v38 = vld [vmem:[%s1036_s3] ss:$0 sm:$0xff]  ;;  %v797_v50 = vld [vmem:[#allocation7 + $0x78] sm:$0xff]   ;;  %v799_v52 = vld [vmem:[#allocation7 + $0x88] sm:$0xff]  }
  0x44   :  { %699 = vmatpush3.bf16.msra.mxu1 %v784_v21  ;;  %v798_v51 = vld [vmem:[#allocation7 + $0x80] sm:$0xff]   ;;  %v800_v53 = vld [vmem:[#allocation7 + $0x90] sm:$0xff]   ;;  %v801_v54 = vld [vmem:[#allocation7 + $0x98] sm:$0xff]  }
  0x45   :  { %652 = vmatpush3.bf16.msra.mxu0 %v773_v8  ;;  %700 = vmatprep.subr.bf16.mxu1 %v907_v0  ;;  %v802_v55 = vld [vmem:[#allocation7 + $0xa0] sm:$0xff]   ;;  %v803_v56 = vld [vmem:[#allocation7 + $0xa8] sm:$0xff]   ;;  %v804_v4 = vld [vmem:[#allocation7 + $0xb0] sm:$0xff]  }
  0x46   :  { %653 = vmatprep.subr.bf16.mxu0 %v774_v9  ;;  %v618_v57 = vld [vmem:[%s1036_s3 + $0x1] ss:$0 sm:$0xff]  ;;  %v805_v5 = vld [vmem:[#allocation7 + $0xb8] sm:$0xff]   ;;  %v627_v6 = vld [vmem:[%s1036_s3 + $0x2] ss:$0 sm:$0xff] }
  0x48   :  { %701 = vmatpush3.bf16.msra.mxu1 %v785_v25 }
  0x49   :  { %654 = vmatpush3.bf16.msra.mxu0 %v775_v10  ;;  %702 = vmatprep.subr.bf16.mxu1 %v907_v0 }
  0x4a   :  { %655 = vmatprep.subr.bf16.mxu0 %v776_v11 }
  0x4c   :  { %703 = vmatpush3.bf16.msra.mxu1 %v786_v27 }
  0x4d   :  { %656 = vmatpush3.bf16.msra.mxu0 %v777_v14  ;;  %704 = vmatprep.subr.bf16.mxu1 %v907_v0 }
  0x4e   :  { %657 = vmatprep.subr.bf16.mxu0 %v778_v17 }
  0x50   :  { %705 = vmatpush3.bf16.msra.mxu1 %v787_v28 }
  0x51   :  { %658 = vmatpush3.bf16.msra.mxu0 %v779_v19  ;;  %706 = vmatprep.subr.bf16.mxu1 %v907_v0 }
  0x52   :  { %659 = vmatprep.subr.bf16.mxu0 %v780_v20 }
  0x54   :  { %707 = vmatpush3.bf16.msra.mxu1 %v788_v29 }
  0x55   :  { %660 = vmatpush3.bf16.msra.mxu0 %v781_v22  ;;  %708 = vmatprep.subr.bf16.mxu1 %v907_v0 }
  0x56   :  { %714 = vmatprep.subr.bf16.mxu0 %v907_v0 }
  0x58   :  { %232 = vmatmul.mubr.bf16.vlgmr.msra.gmra.mrb[0].mxu0 %v64_v26  ;;  %709 = vmatpush3.bf16.msra.mxu1 %v789_v30 }
  0x59   :  { %730 = vmatprep.mubr.msk.bf16.mxu0 %vm908_vm0, %v907_v0  ;;  %734 = vmatprep.subr.bf16.mxu1 %v907_v0 }
  0x5a   :  { %715 = vmatpush3.bf16.msra.mxu0 %v790_v31 }
  0x5b   :  { %716 = vmatprep.subr.bf16.mxu0 %v907_v0 }
  0x5e   :  { %717 = vmatpush3.bf16.msra.mxu0 %v791_v32 }
  0x5f   :  { %718 = vmatprep.subr.bf16.mxu0 %v907_v0 }
  0x62   :  { %719 = vmatpush3.bf16.msra.mxu0 %v792_v33 }
  0x63   :  { %720 = vmatprep.subr.bf16.mxu0 %v907_v0 }
  0x66   :  { %721 = vmatpush3.bf16.msra.mxu0 %v793_v34 }
  0x67   :  { %722 = vmatprep.subr.bf16.mxu0 %v907_v0 }
  0x6a   :  { %723 = vmatpush3.bf16.msra.mxu0 %v794_v35 }
  0x6b   :  { %724 = vmatprep.subr.bf16.mxu0 %v907_v0 }
  0x6e   :  { %725 = vmatpush3.bf16.msra.mxu0 %v795_v36 }
  0x6f   :  { %726 = vmatprep.subr.bf16.mxu0 %v907_v0 }
  0x72   :  { %727 = vmatpush3.bf16.msra.mxu0 %v796_v49 }
  0x73   :  { %728 = vmatprep.subr.bf16.mxu0 %v907_v0 }
  0x76   :  { %729 = vmatpush3.bf16.msra.mxu0 %v797_v50 }
 0x12b   :  { %v661_v37 = vpop.f32.mrb[0].mxu0 }
 0x12c   :  { %v662_v39 = vpop.f32.mrb[1].mxu0 }
 0x12d   :  { %v663_v40 = vadd.f32 %v662_v39, %v661_v37  ;;  %v664_v41 = vpop.f32.mrb[2].mxu0 }
 0x12e   :  { %v665_v42 = vpop.f32.mrb[3].mxu0 }
 0x12f   :  { %v234_v43 = vadd.f32 %v663_v40, %v601_v38  ;;  %v666_v44 = vadd.f32 %v665_v42, %v664_v41 }
 0x131   :  { %v237_v45 = vadd.f32 %v666_v44, %v601_v38  ;;  %v240_v46 = vmax.f32 %v234_v43, 0.0 }
 0x133   :  { %v241_v47 = vmax.f32 %v237_v45, 0.0 }
 0x135   :  { %v242_v48 = vpack.c.bf16 %v241_v47, %v240_v46 }
 0x137   :  { %711 = vmatmul.mubr.bf16.vlgmr.msra.gmra.mrb[0].mxu1 %v242_v48 }
 0x138   :  { %750 = vmatprep.mubr.msk.bf16.mxu1 %vm908_vm0, %v907_v0  ;;  %735 = vmatpush3.bf16.msra.mxu1 %v798_v51 }
 0x139   :  { %736 = vmatprep.subr.bf16.mxu1 %v907_v0 }
 0x13c   :  { %737 = vmatpush3.bf16.msra.mxu1 %v799_v52 }
 0x13d   :  { %738 = vmatprep.subr.bf16.mxu1 %v907_v0 }
 0x140   :  { %739 = vmatpush3.bf16.msra.mxu1 %v800_v53 }
 0x141   :  { %740 = vmatprep.subr.bf16.mxu1 %v907_v0 }
 0x144   :  { %741 = vmatpush3.bf16.msra.mxu1 %v801_v54 }
 0x145   :  { %742 = vmatprep.subr.bf16.mxu1 %v907_v0 }
 0x148   :  { %743 = vmatpush3.bf16.msra.mxu1 %v802_v55 }
 0x149   :  { %744 = vmatprep.subr.bf16.mxu1 %v907_v0 }
 0x14c   :  { %745 = vmatpush3.bf16.msra.mxu1 %v803_v56 }
 0x14d   :  { %746 = vmatprep.subr.bf16.mxu1 %v907_v0 }
 0x150   :  { %747 = vmatpush3.bf16.msra.mxu1 %v804_v4 }
 0x151   :  { %748 = vmatprep.subr.bf16.mxu1 %v907_v0  ;;  %v636_v0 = vld [vmem:[%s1036_s3 + $0x3] ss:$0 sm:$0xff] }
 0x154   :  { %749 = vmatpush3.bf16.msra.mxu1 %v805_v5 }
 0x20a   :  { %v346_v58 = vpop.f32.mrb[0].mxu1 }
 0x20b   :  { %v347_v59 = vadd.f32 %v618_v57, %v346_v58  ;;  %v712_v60 = vpop.f32.mrb[1].mxu1 }
 0x20c   :  { %v349_v61 = vpop.f32.mrb[2].mxu1 }
 0x20d   :  { %v350_v62 = vadd.f32 %v618_v57, %v349_v61  ;;  %v713_v63 = vpop.f32.mrb[3].mxu1  ;;  %v353_v1 = vmax.f32 %v347_v59, 0.0 }
 0x20f   :  { %v354_v2 = vmax.f32 %v350_v62, 0.0 }
 0x211   :  { %v355_v3 = vpack.c.bf16 %v354_v2, %v353_v1 }
 0x213   :  { %731 = vmatmul.mubr.bf16.vlgmr.msra.gmra.mrb[4].mxu0 %v355_v3 }
 0x2e6   :  { %v460_v7 = vpop.f32.mrb[4].mxu0 }
 0x2e7   :  { %v461_v8 = vadd.f32 %v627_v6, %v460_v7  ;;  %v732_v9 = vpop.f32.mrb[5].mxu0 }
 0x2e8   :  { %v463_v10 = vpop.f32.mrb[6].mxu0 }
 0x2e9   :  { %v464_v11 = vadd.f32 %v627_v6, %v463_v10  ;;  %v733_v12 = vpop.f32.mrb[7].mxu0  ;;  %v467_v13 = vmax.f32 %v461_v8, 0.0 }
 0x2eb   :  { %v468_v14 = vmax.f32 %v464_v11, 0.0 }
 0x2ed   :  { %v469_v15 = vpack.c.bf16 %v468_v14, %v467_v13 }
 0x2ef   :  { %751 = vmatmul.mubr.bf16.vlgmr.msra.gmra.mrb[4].mxu1 %v469_v15 }
 0x3c2   :  { %v574_v16 = vpop.f32.mrb[4].mxu1 }
 0x3c3   :  { %v575_v17 = vadd.f32 %v636_v0, %v574_v16  ;;  %v752_v18 = vpop.f32.mrb[5].mxu1 }
 0x3c4   :  { %v577_v19 = vpop.f32.mrb[6].mxu1 }
 0x3c5   :  { %581 = vst [vmem:[#allocation8] sm:$0xff] %v575_v17  ;;  %v578_v20 = vadd.f32 %v636_v0, %v577_v19  ;;  %v753_v21 = vpop.f32.mrb[7].mxu1 }
 0x3c7   :  { %582 = vst [vmem:[#allocation8 + $0x8] sm:$0xff] %v578_v20 }
 0x3c8   :  { %883 = shalt.err (!%p880_p0)
}
 0x3c9   :  { %s884_s12 = scalar_lea.hbm %s1037_s4, 256 }
 0x3ca   :  { %p885_p1 = scmp.ne.s32.totalorder %s1037_s4, %s884_s12  ;;  %p888_p2 = scmp.lt.u32.totalorder %s884_s12, %s1037_s4 }
 0x3cc   :  { %p890_p3 = pnand %p888_p2, %p885_p1 }
 0x3ce   :  { %893 = shalt.err (!%p890_p3)
}
 0x3cf   :  { %s910_s16 = smov 128   ;;  %s911_s17 = smov 8  }
 0x3d0   :  { %594 = dma.vmem_to_hbm [thread:$0]  %s589_s9, 256, %s1037_s4, [#allocation4], %s910_s16, %s910_s16, %s911_s17  }
 0x3d1   :  { %898 = dma.done.wait [#allocation4], 256  }
 0x3d2   :  { %899 = vsyncadd [#allocation4], 4294967040 }
 0x3d3   :  { %598 = vsyncpa [#allocation3], 1 }
 0x3d4   :  { %599 = vsyncpa [#allocation6], 1 }
 0x3d5   :  { %600 = vsyncpa [#allocation4], 1 }

</bundles_post_ra>
